<compile_context>
chip_gen: v6e
topology: v6e:2x2x1
jax: 0.10.0
libtpu: 0.0.40
codegen_flags: <defaults>
</compile_context>

<pallas_src>
import jax
import jax.numpy as jnp
from jax.experimental import pallas as pl
from jax.experimental.pallas import tpu as pltpu


def mlp_kernel(xT_ref, w1t_ref, b1t_ref, w2_ref, b2_ref, oT_ref):
    # xT_ref : (d_in, TB)   inputs, batch on the lane axis
    # w1t_ref: (Hp, d_in)   first-layer weight (transposed), hidden padded
    # b1t_ref: (Hp, 1)      first-layer bias (transposed)
    # w2_ref : (Hp, 1)      output-layer weight (dim_output == 1)
    # b2_ref : (1, 1)       output-layer bias, scalar in SMEM
    # oT_ref : (1, TB)      lane-dense output
    xT = xT_ref[...]

    # Hidden layer: K == d_in (2) is tiny, so compute it on the VPU as a sum
    # of rank-1 broadcasts instead of an MXU matmul.
    hT = b1t_ref[...]                                   # (Hp, 1) broadcast
    for f in range(xT_ref.shape[0]):                    # static, d_in == 2
        hT = hT + w1t_ref[:, f:f + 1] * xT[f:f + 1, :]  # (Hp,1)*(1,TB)->(Hp,TB)
    hT = jnp.maximum(hT, 0.0)                           # ReLU

    # Dropout (eval mode) == identity.
    # TODO(synk): training-mode dropout (Bernoulli mask + 1/(1-p) scaling via
    #             pltpu.prng_random_bits) not implemented; eval forward exact.

    # Output layer: N == 1, so VPU multiply + sublane reduction, no MXU.
    oT_ref[...] = (jnp.sum(hT * w2_ref[...], axis=0, keepdims=True)
                   + b2_ref[0, 0])


def _round_up(n, m):
    return ((n + m - 1) // m) * m


def net_forward(x, w1, b1, w2, b2, *, block_b=512):
    """Forward matching Net(): relu(x @ w1 + b1) -> dropout(eval) -> @ w2 + b2."""
    B, d_in = x.shape
    H = w1.shape[1]
    d_out = w2.shape[1]
    assert d_out == 1, "kernel specialises the dim_output=1 reduction path"

    # Zero-pad hidden to a multiple of the 128-lane width (numerically exact).
    Hp = _round_up(H, 128)
    if Hp != H:
        w1 = jnp.pad(w1, ((0, 0), (0, Hp - H)))
        b1 = jnp.pad(b1, ((0, 0), (0, Hp - H)))
        w2 = jnp.pad(w2, ((0, Hp - H), (0, 0)))

    # Transposed, lane-dense layout: batch maps to lanes; pad batch to the tile.
    tb = min(block_b, _round_up(B, 128))
    Bp = _round_up(B, tb)
    xT = jnp.pad(x, ((0, Bp - B), (0, 0))).T            # (d_in, Bp)
    w1t = w1.T                                          # (Hp, d_in)
    b1t = b1.T                                          # (Hp, 1)
    b2s = b2.reshape(1, 1).astype(jnp.float32)          # (1, 1) scalar -> SMEM

    grid = (Bp // tb,)
    outT = pl.pallas_call(
        mlp_kernel,
        out_shape=jax.ShapeDtypeStruct((d_out, Bp), jnp.float32),
        grid=grid,
        in_specs=[
            pl.BlockSpec((d_in, tb), lambda i: (0, i)),           # x batch tile
            pl.BlockSpec((Hp, d_in), lambda i: (0, 0)),           # VMEM-resident
            pl.BlockSpec((Hp, 1), lambda i: (0, 0)),              # VMEM-resident
            pl.BlockSpec((Hp, 1), lambda i: (0, 0)),              # VMEM-resident
            pl.BlockSpec(memory_space=pltpu.MemorySpace.SMEM),    # scalar b2
        ],
        out_specs=pl.BlockSpec((d_out, tb), lambda i: (0, i)),
        compiler_params=pltpu.CompilerParams(
            dimension_semantics=("parallel",)),
    )(xT, w1t, b1t, w2, b2s)

    return outT.T[:B]                                   # (B, d_out)


def init_params(key, dim_0=2, hidden=200, dim_output=1):
    # Deterministic init mimicking PyTorch nn.Linear default:
    # uniform(-1/sqrt(fan_in), 1/sqrt(fan_in)) for both weight and bias.
    k1, k2, k3, k4 = jax.random.split(key, 4)
    bound1 = 1.0 / jnp.sqrt(jnp.float32(dim_0))
    bound2 = 1.0 / jnp.sqrt(jnp.float32(hidden))
    w1 = jax.random.uniform(k1, (dim_0, hidden), jnp.float32, -bound1, bound1)
    b1 = jax.random.uniform(k2, (1, hidden), jnp.float32, -bound1, bound1)
    w2 = jax.random.uniform(k3, (hidden, dim_output), jnp.float32, -bound2, bound2)
    b2 = jax.random.uniform(k4, (1, dim_output), jnp.float32, -bound2, bound2)
    return w1, b1, w2, b2


if __name__ == "__main__":
    key = jax.random.PRNGKey(0)
    kx, kp = jax.random.split(key)

    batch, dim_0, hidden, dim_output = 8, 2, 200, 1
    x = jax.random.normal(kx, (batch, dim_0), jnp.float32)
    w1, b1, w2, b2 = init_params(kp, dim_0, hidden, dim_output)

    out = net_forward(x, w1, b1, w2, b2)
    out = jax.block_until_ready(out)

    # Pure-JAX reference check of the fused forward (unpadded params).
    ref = jnp.maximum(x @ w1 + b1, 0.0) @ w2 + b2
    assert out.shape == (batch, dim_output)
    assert jnp.allclose(out, ref, atol=1e-5, rtol=1e-5)

    print("KERNEL_OK")
</pallas_src>

<mosaic_0001>
module attributes {stable_mosaic.version = 11 : i64} {
  func.func @mlp_kernel(%arg0: i32, %arg1: memref<2x128xf32, #tpu.memory_space<vmem>>, %arg2: memref<256x2xf32, #tpu.memory_space<vmem>>, %arg3: memref<256x1xf32, #tpu.memory_space<vmem>>, %arg4: memref<256x1xf32, #tpu.memory_space<vmem>>, %arg5: memref<1x1xf32, #tpu.memory_space<smem>>, %arg6: memref<1x128xf32, #tpu.memory_space<vmem>>) attributes {dimension_semantics = [#tpu.dimension_semantics<parallel>], iteration_bounds = array<i64: 1>, scalar_prefetch = 0 : i64, scratch_operands = 0 : i64, tpu.core_type = #tpu.core_type<tc>, window_params = [{transform_indices = @transform_0, window_bounds = array<i64: 2, 128>}, {pipeline_mode = #tpu.pipeline_mode<synchronous>, transform_indices = @transform_1, window_bounds = array<i64: 256, 2>}, {pipeline_mode = #tpu.pipeline_mode<synchronous>, transform_indices = @transform_2, window_bounds = array<i64: 256, 1>}, {pipeline_mode = #tpu.pipeline_mode<synchronous>, transform_indices = @transform_3, window_bounds = array<i64: 256, 1>}, {transform_indices = @transform_4, window_bounds = array<i64: 1, 1>}, {transform_indices = @transform_5, window_bounds = array<i64: 1, 128>}]} {
    %c0 = arith.constant 0 : index
    %c0_0 = arith.constant 0 : index
    %0 = vector.load %arg1[%c0, %c0_0] : memref<2x128xf32, #tpu.memory_space<vmem>>, vector<2x128xf32>
    %c0_1 = arith.constant 0 : index
    %c0_2 = arith.constant 0 : index
    %1 = vector.load %arg3[%c0_1, %c0_2] : memref<256x1xf32, #tpu.memory_space<vmem>>, vector<256x1xf32>
    %c0_3 = arith.constant 0 : index
    %c0_4 = arith.constant 0 : index
    %2 = vector.load %arg2[%c0_3, %c0_4] : memref<256x2xf32, #tpu.memory_space<vmem>>, vector<256x1xf32>
    %3 = vector.extract_strided_slice %0 {offsets = [0, 0], sizes = [1, 128], strides = [1, 1]} : vector<2x128xf32> to vector<1x128xf32>
    %4 = vector.broadcast %2 : vector<256x1xf32> to vector<256x128xf32>
    %5 = vector.broadcast %3 : vector<1x128xf32> to vector<256x128xf32>
    %6 = arith.mulf %4, %5 : vector<256x128xf32>
    %7 = vector.broadcast %1 : vector<256x1xf32> to vector<256x128xf32>
    %8 = arith.addf %7, %6 : vector<256x128xf32>
    %c0_5 = arith.constant 0 : index
    %c1 = arith.constant 1 : index
    %9 = vector.load %arg2[%c0_5, %c1] : memref<256x2xf32, #tpu.memory_space<vmem>>, vector<256x1xf32>
    %10 = vector.extract_strided_slice %0 {offsets = [1, 0], sizes = [1, 128], strides = [1, 1]} : vector<2x128xf32> to vector<1x128xf32>
    %11 = vector.broadcast %9 : vector<256x1xf32> to vector<256x128xf32>
    %12 = vector.broadcast %10 : vector<1x128xf32> to vector<256x128xf32>
    %13 = arith.mulf %11, %12 : vector<256x128xf32>
    %14 = arith.addf %8, %13 : vector<256x128xf32>
    %cst = arith.constant 0.000000e+00 : f32
    %15 = vector.broadcast %cst : f32 to vector<256x128xf32>
    %16 = arith.maximumf %14, %15 : vector<256x128xf32>
    %c0_6 = arith.constant 0 : index
    %c0_7 = arith.constant 0 : index
    %17 = vector.load %arg4[%c0_6, %c0_7] : memref<256x1xf32, #tpu.memory_space<vmem>>, vector<256x1xf32>
    %18 = vector.broadcast %17 : vector<256x1xf32> to vector<256x128xf32>
    %19 = arith.mulf %16, %18 : vector<256x128xf32>
    %cst_8 = arith.constant dense<0.000000e+00> : vector<128xf32>
    %20 = vector.multi_reduction <add>, %19, %cst_8 [0] : vector<256x128xf32> to vector<128xf32>
    %21 = vector.shape_cast %20 : vector<128xf32> to vector<1x128xf32>
    %c0_9 = arith.constant 0 : index
    %c0_10 = arith.constant 0 : index
    %22 = memref.load %arg5[%c0_9, %c0_10] : memref<1x1xf32, #tpu.memory_space<smem>>
    %23 = vector.broadcast %22 : f32 to vector<1x128xf32>
    %24 = arith.addf %21, %23 : vector<1x128xf32>
    %c0_11 = arith.constant 0 : index
    %c0_12 = arith.constant 0 : index
    %25 = vector.load %arg6[%c0_11, %c0_12] : memref<1x128xf32, #tpu.memory_space<vmem>>, vector<1x128xf32>
    tpu.vector_store %arg6[%c0_11, %c0_12], %24 {strides = array<i32>} : memref<1x128xf32, #tpu.memory_space<vmem>>, vector<1x128xf32>,
    return
  }
  func.func @transform_0(%arg0: i32) -> (i32, i32) {
    %c0_i32 = arith.constant 0 : i32
    %c0_i32_0 = arith.constant 0 : i32
    return %c0_i32, %arg0 : i32, i32
  }
  func.func @transform_1(%arg0: i32) -> (i32, i32) {
    %c0_i32 = arith.constant 0 : i32
    %c0_i32_0 = arith.constant 0 : i32
    %c0_i32_1 = arith.constant 0 : i32
    return %c0_i32, %c0_i32_0 : i32, i32
  }
  func.func @transform_2(%arg0: i32) -> (i32, i32) {
    %c0_i32 = arith.constant 0 : i32
    %c0_i32_0 = arith.constant 0 : i32
    %c0_i32_1 = arith.constant 0 : i32
    return %c0_i32, %c0_i32_0 : i32, i32
  }
  func.func @transform_3(%arg0: i32) -> (i32, i32) {
    %c0_i32 = arith.constant 0 : i32
    %c0_i32_0 = arith.constant 0 : i32
    %c0_i32_1 = arith.constant 0 : i32
    return %c0_i32, %c0_i32_0 : i32, i32
  }
  func.func @transform_4(%arg0: i32) -> (i32, i32) {
    %c0_i32 = arith.constant 0 : i32
    %c0_i32_0 = arith.constant 0 : i32
    %c0_i32_1 = arith.constant 0 : i32
    return %c0_i32, %c0_i32_0 : i32, i32
  }
  func.func @transform_5(%arg0: i32) -> (i32, i32) {
    %c0_i32 = arith.constant 0 : i32
    %c0_i32_0 = arith.constant 0 : i32
    return %c0_i32, %arg0 : i32, i32
  }
}

</mosaic_0001>

<bundles_post_ra>
// kernel: tpu_custom_call.1
= control target key start
LH: loop header
LB: loop body
LE: loop exit
PB: predicated region body
PF: predicated region fallthrough
CT: control target
= control target key end

     0   :  { %v1761_v2 = vmov 1   ;;  %v1760_v3 = vmov 0   ;;  %s1754_s0 = inlined_call_operand.vmem [shape: f32[2,128], index: 0, kind: input, shape index: {}]   ;;  %s1755_s1 = inlined_call_operand.vmem [shape: f32[256,2], index: 1, kind: input, shape index: {}]   ;;  %s1756_s2 = inlined_call_operand.vmem [shape: f32[256,1], index: 2, kind: input, shape index: {}]   ;;  %s1757_s3 = inlined_call_operand.vmem [shape: f32[256,1], index: 3, kind: input, shape index: {}]   ;;  %s1758_s4 = inlined_call_operand.<no memory space> [shape: f32[1,1], index: 4, kind: input, shape index: {}]   ;;  %s1759_s5 = inlined_call_operand.hbm [shape: f32[1,128], index: 5, kind: output, shape index: {}]  }
   0x1   :  { %v1050_v0 = vld [vmem:[%s1755_s1 + $0x10] sm:$0xff]  ;;  %v55_v1 = vld [vmem:[%s1755_s1] sm:$0xff]  ;;  %986 = vset.pattern.permute.xlu0 %v1761_v2  ;;  %985 = vset.pattern.permute.xlu1 %v1760_v3  ;;  %v58_v4 = vld [vmem:[%s1755_s1 + $0x18] sm:$0xff] }
   0x2   :  { %99 = vperm.xlu1 %985, %v1050_v0   ;;  %476 = vperm.xlu0 %986, %v55_v1   ;;  %v60_v5 = vld [vmem:[%s1755_s1 + $0x28] sm:$0xff]  ;;  %v62_v6 = vld [vmem:[%s1755_s1 + $0x38] sm:$0xff] }
   0x3   :  { %v64_v7 = vld [vmem:[%s1755_s1 + $0x48] sm:$0xff] }
   0x6   :  { %104 = vperm.xlu1 %985, %v58_v4   ;;  %488 = vperm.xlu0 %986, %v58_v4  }
   0xa   :  { %114 = vperm.xlu1 %985, %v60_v5   ;;  %496 = vperm.xlu0 %986, %v60_v5  }
   0xe   :  { %124 = vperm.xlu1 %985, %v62_v6   ;;  %504 = vperm.xlu0 %986, %v62_v6  }
  0x12   :  { %134 = vperm.xlu1 %985, %v64_v7   ;;  %512 = vperm.xlu0 %986, %v64_v7  }
  0x13   :  { %11 = vsyncpa [#allocation4], 0  ;;  %v66_v8 = vld [vmem:[%s1755_s1 + $0x58] sm:$0xff]  ;;  %v68_v9 = vld [vmem:[%s1755_s1 + $0x68] sm:$0xff]  ;;  %s1016_s28 = smov [#allocation3]  }
  0x14   :  { %v70_v10 = vld [vmem:[%s1755_s1 + $0x78] sm:$0xff]  ;;  %v72_v11 = vld [vmem:[%s1755_s1 + $0x88] sm:$0xff]  ;;  %v1122_v21 = vld [vmem:[%s1755_s1 + $0x20] sm:$0xff]  ;;  %s974_s29 = sshll.u32 %s1016_s28, 4  ;;  %s975_s29 = int_to_ptr.vmem [resolvable:$true] %s974_s29 }
  0x15   :  { %v74_v12 = vld [vmem:[%s1755_s1 + $0x98] sm:$0xff]  ;;  %v76_v13 = vld [vmem:[%s1755_s1 + $0xa8] sm:$0xff]  ;;  %v1131_v23 = vld [vmem:[%s1755_s1 + $0x30] sm:$0xff]  ;;  %s992_s30 = scalar_lea.vmem %s975_s29, 16  ;;  %s996_s6 = scalar_lea.vmem %s975_s29, 32 }
  0x16   :  { %144 = vperm.xlu1 %985, %v66_v8   ;;  %520 = vperm.xlu0 %986, %v66_v8   ;;  %v78_v14 = vld [vmem:[%s1755_s1 + $0xb8] sm:$0xff]  ;;  %v80_v15 = vld [vmem:[%s1755_s1 + $0xc8] sm:$0xff]  ;;  %v1140_v25 = vld [vmem:[%s1755_s1 + $0x40] sm:$0xff]  ;;  %p993_p0 = scmp.ne.s32.totalorder %s975_s29, %s992_s30  ;;  %p997_p1 = scmp.lt.s32.totalorder %s975_s29, %s975_s29 }
  0x17   :  { %v82_v16 = vld [vmem:[%s1755_s1 + $0xd8] sm:$0xff]  ;;  %v1100_v17 = vld [vmem:[%s1755_s1 + $0xe8] sm:$0xff]  ;;  %v1149_v27 = vld [vmem:[%s1755_s1 + $0x50] sm:$0xff]  ;;  %p998_p2 = scmp.lt.s32.totalorder %s996_s6, %s992_s30 }
  0x18   :  { %v1107_v18 = vld [vmem:[%s1755_s1 + $0xf8] sm:$0xff]  ;;  %v1112_v19 = vld [vmem:[%s1755_s1 + $0x8] sm:$0xff]  ;;  %v1158_v29 = vld [vmem:[%s1755_s1 + $0x60] sm:$0xff] }
  0x19   :  { %v24_v20 = vld [vmem:[%s1756_s2 + $0x8] sm:$0xff]  ;;  %v26_v22 = vld [vmem:[%s1756_s2 + $0x18] sm:$0xff]  ;;  %v1167_v31 = vld [vmem:[%s1755_s1 + $0x70] sm:$0xff]  ;;  %p999_p3 = por %p998_p2, %p997_p1 }
  0x1a   :  { %154 = vperm.xlu1 %985, %v68_v9   ;;  %528 = vperm.xlu0 %986, %v68_v9   ;;  %v28_v24 = vld [vmem:[%s1756_s2 + $0x28] sm:$0xff]  ;;  %v30_v26 = vld [vmem:[%s1756_s2 + $0x38] sm:$0xff]  ;;  %v1176_v33 = vld [vmem:[%s1755_s1 + $0x80] sm:$0xff] }
  0x1b   :  { %v32_v28 = vld [vmem:[%s1756_s2 + $0x48] sm:$0xff]  ;;  %v34_v30 = vld [vmem:[%s1756_s2 + $0x58] sm:$0xff]  ;;  %v1185_v35 = vld [vmem:[%s1755_s1 + $0x90] sm:$0xff]  ;;  %p1000_p4 = pnand %p999_p3, %p993_p0 }
  0x1c   :  { %v36_v32 = vld [vmem:[%s1756_s2 + $0x68] sm:$0xff]  ;;  %v38_v34 = vld [vmem:[%s1756_s2 + $0x78] sm:$0xff]  ;;  %v1194_v37 = vld [vmem:[%s1755_s1 + $0xa0] sm:$0xff] }
  0x1d   :  { %v40_v36 = vld [vmem:[%s1756_s2 + $0x88] sm:$0xff]  ;;  %v42_v38 = vld [vmem:[%s1756_s2 + $0x98] sm:$0xff]  ;;  %v1203_v39 = vld [vmem:[%s1755_s1 + $0xb0] sm:$0xff] }
  0x1e   :  { %164 = vperm.xlu1 %985, %v70_v10   ;;  %536 = vperm.xlu0 %986, %v70_v10   ;;  %v44_v40 = vld [vmem:[%s1756_s2 + $0xa8] sm:$0xff]  ;;  %v1212_v41 = vld [vmem:[%s1755_s1 + $0xc0] sm:$0xff]  ;;  %v46_v42 = vld [vmem:[%s1756_s2 + $0xb8] sm:$0xff] }
  0x1f   :  { %v1221_v43 = vld [vmem:[%s1755_s1 + $0xd0] sm:$0xff]  ;;  %v48_v44 = vld [vmem:[%s1756_s2 + $0xc8] sm:$0xff]  ;;  %v1230_v45 = vld [vmem:[%s1755_s1 + $0xe0] sm:$0xff] }
  0x20   :  { %v50_v46 = vld [vmem:[%s1756_s2 + $0xd8] sm:$0xff]  ;;  %v1239_v47 = vld [vmem:[%s1755_s1 + $0xf0] sm:$0xff]  ;;  %v52_v48 = vld [vmem:[%s1756_s2 + $0xe8] sm:$0xff] }
  0x21   :  { %v23_v49 = vld [vmem:[%s1756_s2] sm:$0xff]  ;;  %v54_v50 = vld [vmem:[%s1756_s2 + $0xf8] sm:$0xff]  ;;  %v25_v51 = vld [vmem:[%s1756_s2 + $0x10] sm:$0xff] }
  0x22   :  { %174 = vperm.xlu1 %985, %v72_v11   ;;  %544 = vperm.xlu0 %986, %v72_v11   ;;  %v27_v54 = vld [vmem:[%s1756_s2 + $0x20] sm:$0xff]  ;;  %v29_v57 = vld [vmem:[%s1756_s2 + $0x30] sm:$0xff] }
  0x23   :  { %v31_v60 = vld [vmem:[%s1756_s2 + $0x40] sm:$0xff]  ;;  %v33_v63 = vld [vmem:[%s1756_s2 + $0x50] sm:$0xff] }
  0x24   :  { %v37_v7 = vld [vmem:[%s1756_s2 + $0x70] sm:$0xff]  ;;  %v39_v10 = vld [vmem:[%s1756_s2 + $0x80] sm:$0xff] }
  0x26   :  { %184 = vperm.xlu1 %985, %v74_v12   ;;  %552 = vperm.xlu0 %986, %v74_v12  }
  0x2a   :  { %194 = vperm.xlu1 %985, %v76_v13   ;;  %560 = vperm.xlu0 %986, %v76_v13   ;;  %v41_v13 = vld [vmem:[%s1756_s2 + $0x90] sm:$0xff] }
  0x2e   :  { %204 = vperm.xlu1 %985, %v78_v14   ;;  %568 = vperm.xlu0 %986, %v78_v14  }
  0x32   :  { %214 = vperm.xlu1 %985, %v80_v15   ;;  %576 = vperm.xlu0 %986, %v80_v15  }
  0x36   :  { %224 = vperm.xlu1 %985, %v82_v16   ;;  %584 = vperm.xlu0 %986, %v82_v16   ;;  %v43_v16 = vld [vmem:[%s1756_s2 + $0xa0] sm:$0xff] }
  0x3a   :  { %234 = vperm.xlu1 %985, %v1100_v17   ;;  %988 = vset.pattern.permute.xlu0 %v1760_v3 }
  0x3b   :  { %89 = vperm.xlu0 %988, %v55_v1  }
  0x3e   :  { %244 = vperm.xlu1 %985, %v1107_v18  }
  0x3f   :  { %94 = vperm.xlu0 %988, %v1112_v19  }
  0x42   :  { %290 = vperm.xlu1 %985, %v24_v20  }
  0x43   :  { %109 = vperm.xlu0 %988, %v1122_v21  }
  0x46   :  { %300 = vperm.xlu1 %985, %v26_v22  }
  0x47   :  { %119 = vperm.xlu0 %988, %v1131_v23  }
  0x4a   :  { %310 = vperm.xlu1 %985, %v28_v24   ;;  %v47_v24 = vld [vmem:[%s1756_s2 + $0xc0] sm:$0xff] }
  0x4b   :  { %129 = vperm.xlu0 %988, %v1140_v25  }
  0x4e   :  { %320 = vperm.xlu1 %985, %v30_v26  }
  0x4f   :  { %139 = vperm.xlu0 %988, %v1149_v27  }
  0x52   :  { %330 = vperm.xlu1 %985, %v32_v28   ;;  %v247_v28 = vlaneseq }
  0x53   :  { %149 = vperm.xlu0 %988, %v1158_v29  }
  0x56   :  { %340 = vperm.xlu1 %985, %v34_v30  }
  0x57   :  { %159 = vperm.xlu0 %988, %v1167_v31  }
  0x5a   :  { %350 = vperm.xlu1 %985, %v36_v32   ;;  %v1358_v32 = vshrl.u32 %v247_v28, 7 }
  0x5b   :  { %169 = vperm.xlu0 %988, %v1176_v33  }
  0x5e   :  { %360 = vperm.xlu1 %985, %v38_v34  }
  0x5f   :  { %179 = vperm.xlu0 %988, %v1185_v35  }
  0x62   :  { %370 = vperm.xlu1 %985, %v40_v36   ;;  %v249_v36 = vsub.s32 0, %v1358_v32 }
  0x63   :  { %189 = vperm.xlu0 %988, %v1194_v37  }
  0x66   :  { %380 = vperm.xlu1 %985, %v42_v38   ;;  %v1374_v38 = vld [vmem:[%s1754_s0] sm:$0x3] }
  0x67   :  { %199 = vperm.xlu0 %988, %v1203_v39  }
  0x6a   :  { %390 = vperm.xlu1 %985, %v44_v40   ;;  %v703_v40 = vld [vmem:[%s1757_s3] sm:$0xff] }
  0x6b   :  { %209 = vperm.xlu0 %988, %v1212_v41  }
  0x6e   :  { %400 = vperm.xlu1 %985, %v46_v42  }
  0x6f   :  { %219 = vperm.xlu0 %988, %v1221_v43  }
  0x72   :  { %410 = vperm.xlu1 %985, %v48_v44  }
  0x73   :  { %229 = vperm.xlu0 %988, %v1230_v45  }
  0x76   :  { %420 = vperm.xlu1 %985, %v50_v46  }
  0x77   :  { %239 = vperm.xlu0 %988, %v1239_v47  }
  0x7a   :  { %430 = vperm.xlu1 %985, %v52_v48  }
  0x7b   :  { %285 = vperm.xlu0 %988, %v23_v49   ;;  %v704_v49 = vld [vmem:[%s1757_s3 + $0x8] sm:$0xff] }
  0x7d   :  { %v1254_v52 = vpop.permute.xlu1 %99  ;;  %v1256_v53 = vpop.permute.xlu0 %476 }
  0x7e   :  { %440 = vperm.xlu1 %985, %v54_v50  }
  0x7f   :  { %295 = vperm.xlu0 %988, %v25_v51  }
  0x81   :  { %v1261_v55 = vpop.permute.xlu1 %104  ;;  %v1263_v56 = vpop.permute.xlu0 %488 }
  0x82   :  { %987 = vset.pattern.permute.xlu1 %v1761_v2  ;;  %v728_v2 = vld [vmem:[%s1757_s3 + $0xc8] sm:$0xff] }
  0x83   :  { %480 = vperm.xlu1 %987, %v1112_v19   ;;  %305 = vperm.xlu0 %988, %v27_v54  }
  0x85   :  { %v1270_v58 = vpop.permute.xlu1 %114  ;;  %v1272_v59 = vpop.permute.xlu0 %496 }
  0x87   :  { %484 = vperm.xlu1 %987, %v1050_v0   ;;  %315 = vperm.xlu0 %988, %v29_v57   ;;  %v35_v0 = vld [vmem:[%s1756_s2 + $0x60] sm:$0xff]  ;;  %v705_v57 = vld [vmem:[%s1757_s3 + $0x10] sm:$0xff] }
  0x89   :  { %v1278_v61 = vpop.permute.xlu1 %124  ;;  %v1280_v62 = vpop.permute.xlu0 %504 }
  0x8b   :  { %492 = vperm.xlu1 %987, %v1122_v21   ;;  %325 = vperm.xlu0 %988, %v31_v60   ;;  %v45_v21 = vld [vmem:[%s1756_s2 + $0xb0] sm:$0xff] }
  0x8d   :  { %v1286_v1 = vpop.permute.xlu1 %134  ;;  %v1288_v4 = vpop.permute.xlu0 %512 }
  0x8f   :  { %500 = vperm.xlu1 %987, %v1131_v23   ;;  %335 = vperm.xlu0 %988, %v33_v63   ;;  %v710_v63 = vld [vmem:[%s1757_s3 + $0x38] sm:$0xff] }
  0x91   :  { %v1294_v5 = vpop.permute.xlu1 %144  ;;  %v1296_v6 = vpop.permute.xlu0 %520 }
  0x93   :  { %508 = vperm.xlu1 %987, %v1140_v25   ;;  %345 = vperm.xlu0 %988, %v35_v0  }
  0x95   :  { %v1302_v8 = vpop.permute.xlu1 %154  ;;  %v1304_v9 = vpop.permute.xlu0 %528 }
  0x97   :  { %516 = vperm.xlu1 %987, %v1149_v27   ;;  %355 = vperm.xlu0 %988, %v37_v7   ;;  %v49_v27 = vld [vmem:[%s1756_s2 + $0xd0] sm:$0xff]  ;;  %v707_v7 = vld [vmem:[%s1757_s3 + $0x20] sm:$0xff] }
  0x99   :  { %v1310_v11 = vpop.permute.xlu1 %164  ;;  %v1312_v12 = vpop.permute.xlu0 %536 }
  0x9b   :  { %524 = vperm.xlu1 %987, %v1158_v29   ;;  %365 = vperm.xlu0 %988, %v39_v10  }
  0x9d   :  { %v1318_v14 = vpop.permute.xlu1 %174  ;;  %v1320_v15 = vpop.permute.xlu0 %544 }
  0x9e   :  { %1762 = vst [vmem:[#allocation6_spill] sm:$0xff] %v1320_v15 }
  0x9f   :  { %532 = vperm.xlu1 %987, %v1167_v31   ;;  %375 = vperm.xlu0 %988, %v41_v13   ;;  %v51_v31 = vld [vmem:[%s1756_s2 + $0xe0] sm:$0xff]  ;;  %v712_v13 = vld [vmem:[%s1757_s3 + $0x48] sm:$0xff] }
  0xa1   :  { %v1326_v19 = vpop.permute.xlu1 %184  ;;  %v1328_v20 = vpop.permute.xlu0 %552 }
  0xa2   :  { %1763 = vst [vmem:[#allocation7_spill] sm:$0xff] %v1326_v19  ;;  %1764 = vst [vmem:[#allocation8_spill] sm:$0xff] %v1328_v20  ;;  %v605_v19 = vsub.s32 1, %v1358_v32 }
  0xa3   :  { %540 = vperm.xlu1 %987, %v1176_v33   ;;  %385 = vperm.xlu0 %988, %v43_v16  }
  0xa5   :  { %v1334_v22 = vpop.permute.xlu1 %194  ;;  %v1336_v23 = vpop.permute.xlu0 %560 }
  0xa6   :  { %1765 = vst [vmem:[#allocation9_spill] sm:$0xff] %v1334_v22  ;;  %1766 = vst [vmem:[#allocation10_spill] sm:$0xff] %v1336_v23 }
  0xa7   :  { %548 = vperm.xlu1 %987, %v1185_v35   ;;  %395 = vperm.xlu0 %988, %v45_v21   ;;  %v53_v35 = vld [vmem:[%s1756_s2 + $0xf0] sm:$0xff] }
  0xa8   :  { %v709_v21 = vld [vmem:[%s1757_s3 + $0x30] sm:$0xff] }
  0xa9   :  { %v1342_v25 = vpop.permute.xlu1 %204  ;;  %v1344_v26 = vpop.permute.xlu0 %568 }
  0xaa   :  { %1767 = vst [vmem:[#allocation11_spill] sm:$0xff] %v1342_v25  ;;  %1768 = vst [vmem:[#allocation12_spill] sm:$0xff] %v1344_v26 }
  0xab   :  { %556 = vperm.xlu1 %987, %v1194_v37   ;;  %405 = vperm.xlu0 %988, %v47_v24  }
  0xad   :  { %v1350_v29 = vpop.permute.xlu1 %214  ;;  %v1352_v30 = vpop.permute.xlu0 %576 }
  0xae   :  { %1769 = vst [vmem:[#allocation13_spill] sm:$0xff] %v1350_v29  ;;  %1770 = vst [vmem:[#allocation14_spill] sm:$0xff] %v1352_v30  ;;  %v731_v30 = vld [vmem:[%s1757_s3 + $0xe0] sm:$0xff] }
  0xaf   :  { %564 = vperm.xlu1 %987, %v1203_v39   ;;  %415 = vperm.xlu0 %988, %v49_v27   ;;  %v714_v27 = vld [vmem:[%s1757_s3 + $0x58] sm:$0xff] }
  0xb1   :  { %v1360_v33 = vpop.permute.xlu1 %224  ;;  %v1362_v34 = vpop.permute.xlu0 %584 }
  0xb2   :  { %1771 = vst [vmem:[#allocation15_spill] sm:$0xff] %v1360_v33  ;;  %1772 = vst [vmem:[#allocation16_spill] sm:$0xff] %v1362_v34  ;;  %v1787_v33 = vmov 1  }
  0xb3   :  { %572 = vperm.xlu1 %987, %v1212_v41   ;;  %425 = vperm.xlu0 %988, %v51_v31   ;;  %v1383_v41 = vrot.slane %v1374_v38, %v249_v36  ;;  %v711_v31 = vld [vmem:[%s1757_s3 + $0x40] sm:$0xff]  ;;  %v716_v36 = vld [vmem:[%s1757_s3 + $0x68] sm:$0xff] }
  0xb5   :  { %v1369_v37 = vpop.permute.xlu1 %234  ;;  %v254_v32 = vmul.f32 %v1383_v41, %v1261_v55 }
  0xb6   :  { %1773 = vst [vmem:[#allocation17_spill] sm:$0xff] %v1369_v37  ;;  %v1376_v39 = vpop.permute.xlu0 %89  ;;  %v729_v37 = vld [vmem:[%s1757_s3 + $0xd0] sm:$0xff] }
  0xb7   :  { %580 = vperm.xlu1 %987, %v1221_v43   ;;  %435 = vperm.xlu0 %988, %v53_v35   ;;  %v706_v43 = vld [vmem:[%s1757_s3 + $0x18] sm:$0xff] }
  0xb9   :  { %v1385_v42 = vpop.permute.xlu1 %244 }
  0xba   :  { %1774 = vst [vmem:[#allocation18_spill] sm:$0xff] %v1385_v42  ;;  %v95_v44 = vpop.permute.xlu0 %94 }
  0xbb   :  { %v252_v46 = vmul.f32 %v1383_v41, %v95_v44  ;;  %588 = vperm.xlu1 %987, %v1230_v45   ;;  %737 = vperm.xlu0 %988, %v703_v40   ;;  %v708_v45 = vld [vmem:[%s1757_s3 + $0x28] sm:$0xff]  ;;  %v713_v44 = vld [vmem:[%s1757_s3 + $0x50] sm:$0xff] }
  0xbd   :  { %v291_v48 = vpop.permute.xlu1 %290 }
  0xbe   :  { %v1395_v50 = vadd.f32 %v291_v48, %v252_v46  ;;  %v1397_v51 = vpop.permute.xlu0 %109 }
  0xbf   :  { %989 = vset.pattern.permute.xlu1 %v1760_v3  ;;  %752 = vperm.xlu0 %988, %v706_v43   ;;  %v718_v43 = vld [vmem:[%s1757_s3 + $0x78] sm:$0xff] }
  0xc0   :  { %742 = vperm.xlu1 %989, %v704_v49   ;;  %v715_v49 = vld [vmem:[%s1757_s3 + $0x60] sm:$0xff] }
  0xc1   :  { %v1403_v54 = vpop.permute.xlu1 %300 }
  0xc2   :  { %v1408_v60 = vpop.permute.xlu0 %119 }
  0xc3   :  { %762 = vperm.xlu0 %988, %v708_v45  }
  0xc4   :  { %747 = vperm.xlu1 %989, %v705_v57   ;;  %v720_v57 = vld [vmem:[%s1757_s3 + $0x88] sm:$0xff] }
  0xc5   :  { %v1413_v0 = vpop.permute.xlu1 %310 }
  0xc6   :  { %v1418_v10 = vpop.permute.xlu0 %129 }
  0xc7   :  { %772 = vperm.xlu0 %988, %v710_v63  }
  0xc8   :  { %757 = vperm.xlu1 %989, %v707_v7   ;;  %v717_v7 = vld [vmem:[%s1757_s3 + $0x70] sm:$0xff] }
  0xc9   :  { %v1423_v16 = vpop.permute.xlu1 %320 }
  0xca   :  { %v1428_v24 = vpop.permute.xlu0 %139 }
  0xcb   :  { %782 = vperm.xlu0 %988, %v712_v13  }
  0xcc   :  { %767 = vperm.xlu1 %989, %v709_v21   ;;  %v722_v21 = vld [vmem:[%s1757_s3 + $0x98] sm:$0xff] }
  0xcd   :  { %v1433_v28 = vpop.permute.xlu1 %330 }
  0xce   :  { %v1438_v35 = vpop.permute.xlu0 %149 }
  0xcf   :  { %792 = vperm.xlu0 %988, %v714_v27  }
  0xd0   :  { %777 = vperm.xlu1 %989, %v711_v31   ;;  %v719_v31 = vld [vmem:[%s1757_s3 + $0x80] sm:$0xff] }
  0xd1   :  { %v1443_v40 = vpop.permute.xlu1 %340 }
  0xd2   :  { %v1448_v46 = vpop.permute.xlu0 %159 }
  0xd3   :  { %802 = vperm.xlu0 %988, %v716_v36  }
  0xd4   :  { %787 = vperm.xlu1 %989, %v713_v44   ;;  %v724_v44 = vld [vmem:[%s1757_s3 + $0xa8] sm:$0xff] }
  0xd5   :  { %v1453_v48 = vpop.permute.xlu1 %350 }
  0xd6   :  { %v1458_v45 = vpop.permute.xlu0 %169 }
  0xd7   :  { %812 = vperm.xlu0 %988, %v718_v43  }
  0xd8   :  { %797 = vperm.xlu1 %989, %v715_v49   ;;  %v721_v49 = vld [vmem:[%s1757_s3 + $0x90] sm:$0xff] }
  0xd9   :  { %v1463_v63 = vpop.permute.xlu1 %360 }
  0xda   :  { %v1468_v13 = vpop.permute.xlu0 %179 }
  0xdb   :  { %1775 = vst [vmem:[#allocation19_spill] sm:$0xff] %v1468_v13  ;;  %822 = vperm.xlu0 %988, %v720_v57  }
  0xdc   :  { %807 = vperm.xlu1 %989, %v717_v7   ;;  %v726_v7 = vld [vmem:[%s1757_s3 + $0xb8] sm:$0xff] }
  0xdd   :  { %v1473_v27 = vpop.permute.xlu1 %370 }
  0xde   :  { %v1478_v36 = vpop.permute.xlu0 %189 }
  0xdf   :  { %1776 = vst [vmem:[#allocation20_spill] sm:$0xff] %v1478_v36  ;;  %832 = vperm.xlu0 %988, %v722_v21  }
  0xe0   :  { %817 = vperm.xlu1 %989, %v719_v31   ;;  %v723_v31 = vld [vmem:[%s1757_s3 + $0xa0] sm:$0xff] }
  0xe1   :  { %v1483_v43 = vpop.permute.xlu1 %380 }
  0xe2   :  { %1777 = vst [vmem:[#allocation21_spill] sm:$0xff] %v1483_v43  ;;  %v1488_v57 = vpop.permute.xlu0 %199 }
  0xe3   :  { %1778 = vst [vmem:[#allocation22_spill] sm:$0xff] %v1488_v57  ;;  %842 = vperm.xlu0 %988, %v724_v44  }
  0xe4   :  { %827 = vperm.xlu1 %989, %v721_v49   ;;  %v725_v49 = vld [vmem:[%s1757_s3 + $0xb0] sm:$0xff] }
  0xe5   :  { %v1493_v21 = vpop.permute.xlu1 %390 }
  0xe6   :  { %1779 = vst [vmem:[#allocation23_spill] sm:$0xff] %v1493_v21  ;;  %v1498_v3 = vpop.permute.xlu0 %209 }
  0xe7   :  { %1780 = vst [vmem:[#allocation24_spill] sm:$0xff] %v1498_v3  ;;  %852 = vperm.xlu0 %988, %v726_v7  }
  0xe8   :  { %837 = vperm.xlu1 %989, %v723_v31   ;;  %v727_v31 = vld [vmem:[%s1757_s3 + $0xc0] sm:$0xff] }
  0xe9   :  { %v1503_v44 = vpop.permute.xlu1 %400 }
  0xea   :  { %1781 = vst [vmem:[#allocation25_spill] sm:$0xff] %v1503_v44  ;;  %v1508_v42 = vpop.permute.xlu0 %219 }
  0xeb   :  { %1782 = vst [vmem:[#allocation26_spill] sm:$0xff] %v1508_v42  ;;  %862 = vperm.xlu0 %988, %v728_v2   ;;  %v730_v42 = vld [vmem:[%s1757_s3 + $0xd8] sm:$0xff] }
  0xec   :  { %847 = vperm.xlu1 %989, %v725_v49  }
  0xed   :  { %v1513_v7 = vpop.permute.xlu1 %410 }
  0xee   :  { %1783 = vst [vmem:[#allocation27_spill] sm:$0xff] %v1513_v7  ;;  %v1518_v34 = vpop.permute.xlu0 %229 }
  0xef   :  { %1784 = vst [vmem:[#allocation28_spill] sm:$0xff] %v1518_v34  ;;  %867 = vperm.xlu0 %988, %v729_v37   ;;  %v251_v34 = vmul.f32 %v1383_v41, %v1376_v39 }
  0xf0   :  { %857 = vperm.xlu1 %989, %v727_v31  }
  0xf1   :  { %v1523_v2 = vpop.permute.xlu1 %420 }
  0xf2   :  { %1785 = vst [vmem:[#allocation29_spill] sm:$0xff] %v1523_v2  ;;  %v1525_v49 = vpop.permute.xlu0 %239 }
  0xf3   :  { %1786 = vst [vmem:[#allocation30_spill] sm:$0xff] %v1525_v49  ;;  %872 = vperm.xlu0 %988, %v730_v42   ;;  %v733_v42 = vld [vmem:[%s1757_s3 + $0xf0] sm:$0xff] }
  0xf4   :  { %990 = vset.pattern.permute.xlu1 %v1787_v33 }
  0xf5   :  { %592 = vperm.xlu1 %990, %v1100_v17   ;;  %v1534_v37 = vpop.permute.xlu1 %430  ;;  %v732_v17 = vld [vmem:[%s1757_s3 + $0xe8] sm:$0xff] }
  0xf6   :  { %1788 = vst [vmem:[#allocation31_spill] sm:$0xff] %v1534_v37  ;;  %v286_v31 = vpop.permute.xlu0 %285 }
  0xf7   :  { %v443_v7 = vadd.f32 %v286_v31, %v251_v34  ;;  %877 = vperm.xlu0 %988, %v731_v30   ;;  %v1790_v34 = vmov 0  }
  0xf9   :  { %596 = vperm.xlu1 %990, %v1239_v47   ;;  %v1540_v33 = vpop.permute.xlu1 %440  ;;  %v734_v47 = vld [vmem:[%s1757_s3 + $0xf8] sm:$0xff] }
  0xfa   :  { %1789 = vst [vmem:[#allocation32_spill] sm:$0xff] %v1540_v33  ;;  %v296_v49 = vpop.permute.xlu0 %295 }
  0xfb   :  { %887 = vperm.xlu0 %988, %v733_v42  }
  0xfd   :  { %600 = vperm.xlu1 %990, %v1107_v18  }
  0xfe   :  { %v481_v39 = vpop.permute.xlu1 %480  ;;  %v306_v2 = vpop.permute.xlu0 %305 }
 0x101   :  { %991 = vset.pattern.permute.xlu1 %v1790_v34 }
 0x102   :  { %882 = vperm.xlu1 %991, %v732_v17   ;;  %v485_v30 = vpop.permute.xlu1 %484  ;;  %v1547_v31 = vpop.permute.xlu0 %315 }
 0x106   :  { %892 = vperm.xlu1 %991, %v734_v47   ;;  %v493_v42 = vpop.permute.xlu1 %492  ;;  %v1552_v33 = vpop.permute.xlu0 %325 }
 0x10a   :  { %v501_v18 = vpop.permute.xlu1 %500  ;;  %v1554_v37 = vpop.permute.xlu0 %335 }
 0x10e   :  { %v1556_v3 = vpop.permute.xlu1 %508  ;;  %v1558_v29 = vpop.permute.xlu0 %345 }
 0x112   :  { %v1560_v34 = vpop.permute.xlu1 %516  ;;  %v1562_v17 = vpop.permute.xlu0 %355 }
 0x116   :  { %v1564_v26 = vpop.permute.xlu1 %524  ;;  %v1566_v44 = vpop.permute.xlu0 %365 }
 0x11a   :  { %v1568_v57 = vpop.permute.xlu1 %532  ;;  %v1570_v47 = vpop.permute.xlu0 %375 }
 0x11b   :  { %1791 = vst [vmem:[#allocation33_spill] sm:$0xff] %v1570_v47 }
 0x11e   :  { %v1572_v25 = vpop.permute.xlu1 %540  ;;  %v1574_v23 = vpop.permute.xlu0 %385 }
 0x11f   :  { %1792 = vst [vmem:[#allocation34_spill] sm:$0xff] %v1574_v23  ;;  %v1594_v23 = vrot.slane %v1374_v38, %v605_v19 }
 0x121   :  { %v609_v19 = vmul.f32 %v1594_v23, %v485_v30  ;;  %v610_v55 = vmul.f32 %v1594_v23, %v1263_v56  ;;  %v257_v56 = vmul.f32 %v1383_v41, %v1408_v60  ;;  %v259_v60 = vmul.f32 %v1383_v41, %v1418_v10 }
 0x122   :  { %v1576_v21 = vpop.permute.xlu1 %548  ;;  %v1578_v36 = vpop.permute.xlu0 %395  ;;  %v616_v10 = vmul.f32 %v1594_v23, %v1288_v4 }
 0x123   :  { %1793 = vst [vmem:[#allocation35_spill] sm:$0xff] %v1576_v21  ;;  %1794 = vst [vmem:[#allocation36_spill] sm:$0xff] %v1578_v36  ;;  %v608_v21 = vmul.f32 %v1594_v23, %v481_v39 }
 0x126   :  { %v1580_v22 = vpop.permute.xlu1 %556  ;;  %v1582_v20 = vpop.permute.xlu0 %405 }
 0x127   :  { %1795 = vst [vmem:[#allocation37_spill] sm:$0xff] %v1580_v22  ;;  %1796 = vst [vmem:[#allocation38_spill] sm:$0xff] %v1582_v20  ;;  %v607_v20 = vmul.f32 %v1594_v23, %v1256_v53  ;;  %v256_v53 = vmul.f32 %v1383_v41, %v1270_v58  ;;  %v612_v58 = vmul.f32 %v1594_v23, %v1272_v59 }
 0x129   :  { %v448_v30 = vadd.f32 %v1413_v0, %v256_v53 }
 0x12a   :  { %v1584_v43 = vpop.permute.xlu1 %564  ;;  %v1586_v13 = vpop.permute.xlu0 %415 }
 0x12b   :  { %1797 = vst [vmem:[#allocation39_spill] sm:$0xff] %v1584_v43  ;;  %1798 = vst [vmem:[#allocation40_spill] sm:$0xff] %v1586_v13  ;;  %v253_v13 = vmul.f32 %v1383_v41, %v1254_v52  ;;  %v255_v52 = vmul.f32 %v1383_v41, %v1397_v51  ;;  %v611_v43 = vmul.f32 %v1594_v23, %v493_v42 }
 0x12c   :  { %v258_v51 = vmul.f32 %v1383_v41, %v1278_v61  ;;  %v614_v61 = vmul.f32 %v1594_v23, %v1280_v62  ;;  %v451_v62 = vadd.f32 %v1552_v33, %v259_v60  ;;  %v266_v60 = vmul.f32 %v1383_v41, %v1310_v11 }
 0x12e   :  { %v1589_v15 = vpop.permute.xlu1 %572  ;;  %v1591_v47 = vpop.permute.xlu0 %425 }
 0x12f   :  { %1799 = vst [vmem:[#allocation41_spill] sm:$0xff] %v1589_v15  ;;  %1800 = vst [vmem:[#allocation42_spill] sm:$0xff] %v1591_v47  ;;  %v639_v15 = vadd.f32 %v607_v20, %v443_v7  ;;  %v640_v47 = vadd.f32 %v608_v21, %v1395_v50 }
 0x131   :  { %v671_v50 = vmax.f32 %v639_v15, 0.0  ;;  %v672_v7 = vmax.f32 %v640_v47, 0.0  ;;  %v613_v15 = vmul.f32 %v1594_v23, %v501_v18 }
 0x132   :  { %v1597_v36 = vpop.permute.xlu1 %580  ;;  %v1599_v22 = vpop.permute.xlu0 %435 }
 0x133   :  { %1801 = vst [vmem:[#allocation43_spill] sm:$0xff] %v1597_v36  ;;  %1802 = vst [vmem:[#allocation44_spill] sm:$0xff] %v1599_v22  ;;  %v446_v36 = vadd.f32 %v1403_v54, %v254_v32  ;;  %v445_v22 = vadd.f32 %v296_v49, %v253_v13 }
 0x135   :  { %v641_v20 = vadd.f32 %v609_v19, %v445_v22  ;;  %v642_v13 = vadd.f32 %v610_v55, %v446_v36  ;;  %v450_v36 = vadd.f32 %v1423_v16, %v258_v51 }
 0x136   :  { %v1609_v38 = vpop.permute.xlu1 %588  ;;  %v738_v39 = vpop.permute.xlu0 %737 }
 0x137   :  { %1803 = vst [vmem:[#allocation45_spill] sm:$0xff] %v1609_v38  ;;  %v447_v38 = vadd.f32 %v306_v2, %v255_v52  ;;  %v895_v49 = vmul.f32 %v738_v39, %v671_v50  ;;  %v673_v0 = vmax.f32 %v641_v20, 0.0  ;;  %v644_v2 = vadd.f32 %v612_v58, %v448_v30 }
 0x138   :  { %v449_v39 = vadd.f32 %v1547_v31, %v257_v56  ;;  %v674_v53 = vmax.f32 %v642_v13, 0.0  ;;  %v615_v52 = vmul.f32 %v1594_v23, %v1556_v3  ;;  %v646_v31 = vadd.f32 %v614_v61, %v450_v36 }
 0x139   :  { %v643_v42 = vadd.f32 %v611_v43, %v447_v38  ;;  %v260_v43 = vmul.f32 %v1383_v41, %v1286_v1  ;;  %v676_v50 = vmax.f32 %v644_v2, 0.0  ;;  %v262_v13 = vmul.f32 %v1383_v41, %v1294_v5 }
 0x13a   :  { %v753_v21 = vpop.permute.xlu0 %752  ;;  %v645_v38 = vadd.f32 %v613_v15, %v449_v39  ;;  %v261_v3 = vmul.f32 %v1383_v41, %v1428_v24  ;;  %v678_v15 = vmax.f32 %v646_v31, 0.0  ;;  %v618_v24 = vmul.f32 %v1594_v23, %v1296_v6 }
 0x13b   :  { %v743_v54 = vpop.permute.xlu1 %742  ;;  %v675_v18 = vmax.f32 %v643_v42, 0.0  ;;  %v898_v16 = vmul.f32 %v753_v21, %v674_v53  ;;  %v452_v30 = vadd.f32 %v1433_v28, %v260_v43  ;;  %v617_v21 = vmul.f32 %v1594_v23, %v1560_v34 }
 0x13c   :  { %v896_v32 = vmul.f32 %v743_v54, %v672_v7  ;;  %v677_v51 = vmax.f32 %v645_v38, 0.0  ;;  %v454_v33 = vadd.f32 %v1443_v40, %v262_v13  ;;  %v453_v42 = vadd.f32 %v1554_v37, %v261_v3 }
 0x13d   :  { %v648_v4 = vadd.f32 %v616_v10, %v452_v30  ;;  %v264_v34 = vmul.f32 %v1383_v41, %v1302_v8  ;;  %v619_v40 = vmul.f32 %v1594_v23, %v1564_v26  ;;  %v265_v26 = vmul.f32 %v1383_v41, %v1448_v46 }
 0x13e   :  { %v927_v22 = vadd.f32 %v896_v32, %v895_v49  ;;  %v763_v47 = vpop.permute.xlu0 %762  ;;  %v647_v49 = vadd.f32 %v615_v52, %v451_v62  ;;  %v650_v39 = vadd.f32 %v618_v24, %v454_v33  ;;  %v622_v46 = vmul.f32 %v1594_v23, %v1312_v12  ;;  %v1808_v24 = vld [vmem:[#allocation21_spill] sm:$0xff] }
 0x13f   :  { %v748_v19 = vpop.permute.xlu1 %747  ;;  %v900_v32 = vmul.f32 %v763_v47, %v676_v50  ;;  %v263_v47 = vmul.f32 %v1383_v41, %v1438_v35  ;;  %v456_v53 = vadd.f32 %v1453_v48, %v264_v34  ;;  %v680_v61 = vmax.f32 %v648_v4, 0.0 }
 0x140   :  { %v897_v59 = vmul.f32 %v748_v19, %v673_v0  ;;  %v649_v0 = vadd.f32 %v617_v21, %v453_v42  ;;  %v679_v19 = vmax.f32 %v647_v49, 0.0  ;;  %v620_v35 = vmul.f32 %v1594_v23, %v1304_v9 }
 0x141   :  { %v455_v6 = vadd.f32 %v1558_v29, %v263_v47  ;;  %v621_v48 = vmul.f32 %v1594_v23, %v1568_v57  ;;  %v458_v50 = vadd.f32 %v1463_v63, %v266_v60  ;;  %v457_v9 = vadd.f32 %v1562_v17, %v265_v26 }
 0x142   :  { %v928_v55 = vadd.f32 %v927_v22, %v897_v59  ;;  %v773_v20 = vpop.permute.xlu0 %772  ;;  %v268_v30 = vmul.f32 %v1383_v41, %v1318_v14  ;;  %v267_v57 = vmul.f32 %v1383_v41, %v1458_v45  ;;  %v623_v62 = vmul.f32 %v1594_v23, %v1572_v25 }
 0x143   :  { %v758_v7 = vpop.permute.xlu1 %757  ;;  %v902_v2 = vmul.f32 %v773_v20, %v678_v15  ;;  %v651_v38 = vadd.f32 %v619_v40, %v455_v6  ;;  %v682_v20 = vmax.f32 %v650_v39, 0.0  ;;  %v654_v12 = vadd.f32 %v622_v46, %v458_v50  ;;  %v1812_v6 = vld [vmem:[#allocation20_spill] sm:$0xff]  ;;  %v1817_v46 = vld [vmem:[#allocation11_spill] sm:$0xff] }
 0x144   :  { %v899_v54 = vmul.f32 %v758_v7, %v675_v18  ;;  %v929_v1 = vadd.f32 %v928_v55, %v898_v16  ;;  %v681_v18 = vmax.f32 %v649_v0, 0.0  ;;  %v652_v55 = vadd.f32 %v620_v35, %v456_v53  ;;  %v1809_v0 = vld [vmem:[#allocation33_spill] sm:$0xff] }
 0x145   :  { %v683_v13 = vmax.f32 %v651_v38, 0.0  ;;  %v460_v17 = vadd.f32 %v1473_v27, %v268_v30  ;;  %v459_v3 = vadd.f32 %v1566_v44, %v267_v57  ;;  %v1811_v53 = vld [vmem:[#allocation9_spill] sm:$0xff]  ;;  %v274_v30 = vmul.f32 %v1383_v41, %v1817_v46  ;;  %v1818_v57 = vld [vmem:[#allocation22_spill] sm:$0xff] }
 0x146   :  { %v930_v58 = vadd.f32 %v929_v1, %v899_v54  ;;  %v783_v28 = vpop.permute.xlu0 %782  ;;  %v653_v54 = vadd.f32 %v621_v48, %v457_v9  ;;  %v684_v49 = vmax.f32 %v652_v55, 0.0  ;;  %v1813_v35 = vld [vmem:[#allocation37_spill] sm:$0xff] }
 0x147   :  { %v768_v56 = vpop.permute.xlu1 %767  ;;  %v904_v52 = vmul.f32 %v783_v28, %v680_v61  ;;  %v1805_v28 = vld [vmem:[#allocation7_spill] sm:$0xff]  ;;  %v655_v42 = vadd.f32 %v623_v62, %v459_v3  ;;  %v271_v61 = vmul.f32 %v1383_v41, %v1812_v6  ;;  %v627_v60 = vmul.f32 %v1594_v23, %v1813_v35  ;;  %v1828_v6 = vld [vmem:[#allocation14_spill] sm:$0xff] }
 0x148   :  { %v901_v22 = vmul.f32 %v768_v56, %v677_v51  ;;  %v931_v5 = vadd.f32 %v930_v58, %v900_v32  ;;  %v1804_v58 = vld [vmem:[#allocation6_spill] sm:$0xff]  ;;  %v270_v25 = vmul.f32 %v1383_v41, %v1805_v28  ;;  %v1806_v51 = vld [vmem:[#allocation19_spill] sm:$0xff]  ;;  %v273_v62 = vmul.f32 %v1383_v41, %v1818_v57  ;;  %v1834_v57 = vld [vmem:[#allocation16_spill] sm:$0xff] }
 0x149   :  { %v624_v45 = vmul.f32 %v1594_v23, %v1804_v58  ;;  %v269_v33 = vmul.f32 %v1383_v41, %v1806_v51  ;;  %v1807_v56 = vld [vmem:[#allocation35_spill] sm:$0xff]  ;;  %v1822_v51 = vld [vmem:[#allocation12_spill] sm:$0xff]  ;;  %v1830_v35 = vld [vmem:[#allocation26_spill] sm:$0xff] }
 0x14a   :  { %v932_v37 = vadd.f32 %v931_v5, %v901_v22  ;;  %v793_v36 = vpop.permute.xlu0 %792  ;;  %v625_v27 = vmul.f32 %v1594_v23, %v1807_v56  ;;  %v685_v22 = vmax.f32 %v653_v54, 0.0  ;;  %v462_v34 = vadd.f32 %v1808_v24, %v270_v25  ;;  %v1819_v54 = vld [vmem:[#allocation39_spill] sm:$0xff] }
 0x14b   :  { %v778_v59 = vpop.permute.xlu1 %777  ;;  %v906_v1 = vmul.f32 %v793_v36, %v682_v20  ;;  %v656_v5 = vadd.f32 %v624_v45, %v460_v17  ;;  %v461_v40 = vadd.f32 %v1809_v0, %v269_v33  ;;  %v1815_v20 = vld [vmem:[#allocation34_spill] sm:$0xff]  ;;  %v630_v33 = vmul.f32 %v1594_v23, %v1822_v51 }
 0x14c   :  { %v903_v43 = vmul.f32 %v778_v59, %v679_v19  ;;  %v933_v8 = vadd.f32 %v932_v37, %v902_v2  ;;  %v686_v2 = vmax.f32 %v654_v12, 0.0  ;;  %v1810_v19 = vld [vmem:[#allocation8_spill] sm:$0xff]  ;;  %v272_v59 = vmul.f32 %v1383_v41, %v1811_v53 }
 0x14d   :  { %v626_v39 = vmul.f32 %v1594_v23, %v1810_v19 }
 0x14e   :  { %v934_v16 = vadd.f32 %v933_v8, %v903_v43  ;;  %v803_v29 = vpop.permute.xlu0 %802  ;;  %v687_v43 = vmax.f32 %v655_v42, 0.0  ;;  %v657_v8 = vadd.f32 %v625_v27, %v461_v40  ;;  %v1823_v42 = vld [vmem:[#allocation13_spill] sm:$0xff]  ;;  %v1824_v27 = vld [vmem:[#allocation24_spill] sm:$0xff]  ;;  %v1826_v40 = vld [vmem:[#allocation27_spill] sm:$0xff] }
 0x14f   :  { %v788_v31 = vpop.permute.xlu1 %787  ;;  %v908_v4 = vmul.f32 %v803_v29, %v684_v49  ;;  %v658_v48 = vadd.f32 %v626_v39, %v462_v34  ;;  %v1814_v29 = vld [vmem:[#allocation23_spill] sm:$0xff]  ;;  %v1821_v49 = vld [vmem:[#allocation36_spill] sm:$0xff]  ;;  %v276_v56 = vmul.f32 %v1383_v41, %v1823_v42 }
 0x150   :  { %v905_v7 = vmul.f32 %v788_v31, %v681_v18  ;;  %v935_v11 = vadd.f32 %v934_v16, %v904_v52  ;;  %v688_v52 = vmax.f32 %v656_v5, 0.0  ;;  %v464_v55 = vadd.f32 %v1814_v29, %v272_v59 }
 0x151   :  { %v463_v31 = vadd.f32 %v1815_v20, %v271_v61  ;;  %v689_v3 = vmax.f32 %v657_v8, 0.0  ;;  %v690_v45 = vmax.f32 %v658_v48, 0.0  ;;  %v632_v61 = vmul.f32 %v1594_v23, %v1828_v6  ;;  %v1840_v6 = vld [vmem:[#allocation31_spill] sm:$0xff] }
 0x152   :  { %v936_v10 = vadd.f32 %v935_v11, %v905_v7  ;;  %v813_v63 = vpop.permute.xlu0 %812  ;;  %v1816_v7 = vld [vmem:[#allocation10_spill] sm:$0xff] }
 0x153   :  { %v798_v21 = vpop.permute.xlu1 %797  ;;  %v910_v26 = vmul.f32 %v813_v63, %v686_v2  ;;  %v628_v11 = vmul.f32 %v1594_v23, %v1816_v7  ;;  %v468_v2 = vadd.f32 %v1826_v40, %v276_v56  ;;  %v1833_v7 = vld [vmem:[#allocation40_spill] sm:$0xff]  ;;  %v1838_v40 = vld [vmem:[#allocation17_spill] sm:$0xff] }
 0x154   :  { %v907_v32 = vmul.f32 %v798_v21, %v683_v13  ;;  %v937_v14 = vadd.f32 %v936_v10, %v906_v1  ;;  %v629_v1 = vmul.f32 %v1594_v23, %v1819_v54  ;;  %v659_v10 = vadd.f32 %v627_v60, %v463_v31  ;;  %v1820_v21 = vld [vmem:[#allocation25_spill] sm:$0xff]  ;;  %v1835_v54 = vld [vmem:[#allocation28_spill] sm:$0xff] }
 0x155   :  { %v466_v12 = vadd.f32 %v1820_v21, %v274_v30  ;;  %v660_v58 = vadd.f32 %v628_v11, %v464_v55  ;;  %v277_v60 = vmul.f32 %v1383_v41, %v1830_v35  ;;  %v664_v55 = vadd.f32 %v632_v61, %v468_v2 }
 0x156   :  { %v938_v44 = vadd.f32 %v937_v14, %v907_v32  ;;  %v823_v15 = vpop.permute.xlu0 %822  ;;  %v465_v32 = vadd.f32 %v1821_v49, %v273_v62  ;;  %v634_v62 = vmul.f32 %v1594_v23, %v1834_v57  ;;  %v1837_v49 = vld [vmem:[#allocation42_spill] sm:$0xff]  ;;  %v280_v2 = vmul.f32 %v1383_v41, %v1838_v40 }
 0x157   :  { %v808_v47 = vpop.permute.xlu1 %807  ;;  %v912_v63 = vmul.f32 %v823_v15, %v688_v52  ;;  %v1825_v15 = vld [vmem:[#allocation41_spill] sm:$0xff]  ;;  %v662_v0 = vadd.f32 %v630_v33, %v466_v12  ;;  %v692_v39 = vmax.f32 %v660_v58, 0.0  ;;  %v469_v11 = vadd.f32 %v1833_v7, %v277_v60  ;;  %v1842_v60 = vld [vmem:[#allocation18_spill] sm:$0xff] }
 0x158   :  { %v909_v37 = vmul.f32 %v808_v47, %v685_v22  ;;  %v939_v36 = vadd.f32 %v938_v44, %v908_v4  ;;  %v275_v4 = vmul.f32 %v1383_v41, %v1824_v27  ;;  %v661_v44 = vadd.f32 %v629_v1, %v465_v32 }
 0x159   :  { %v631_v22 = vmul.f32 %v1594_v23, %v1825_v15  ;;  %v691_v47 = vmax.f32 %v659_v10, 0.0  ;;  %v694_v20 = vmax.f32 %v662_v0, 0.0  ;;  %v279_v1 = vmul.f32 %v1383_v41, %v1835_v54  ;;  %v1836_v10 = vld [vmem:[#allocation45_spill] sm:$0xff] }
 0x15a   :  { %v940_v18 = vadd.f32 %v939_v36, %v909_v37  ;;  %v833_v38 = vpop.permute.xlu0 %832  ;;  %v1827_v36 = vld [vmem:[#allocation38_spill] sm:$0xff]  ;;  %v472_v61 = vadd.f32 %v1840_v6, %v280_v2 }
 0x15b   :  { %v818_v16 = vpop.permute.xlu1 %817  ;;  %v914_v5 = vmul.f32 %v833_v38, %v690_v45  ;;  %v467_v19 = vadd.f32 %v1827_v36, %v275_v4  ;;  %v1831_v38 = vld [vmem:[#allocation43_spill] sm:$0xff]  ;;  %v471_v32 = vadd.f32 %v1837_v49, %v279_v1  ;;  %v696_v45 = vmax.f32 %v664_v55, 0.0 }
 0x15c   :  { %v911_v50 = vmul.f32 %v818_v16, %v687_v43  ;;  %v941_v9 = vadd.f32 %v940_v18, %v910_v26  ;;  %v1829_v43 = vld [vmem:[#allocation15_spill] sm:$0xff]  ;;  %v693_v26 = vmax.f32 %v661_v44, 0.0  ;;  %v633_v48 = vmul.f32 %v1594_v23, %v1831_v38 }
 0x15d   :  { %v278_v8 = vmul.f32 %v1383_v41, %v1829_v43  ;;  %v663_v18 = vadd.f32 %v631_v22, %v467_v19  ;;  %v1841_v43 = vld [vmem:[#allocation44_spill] sm:$0xff] }
 0x15e   :  { %v942_v13 = vadd.f32 %v941_v9, %v911_v50  ;;  %v843_v17 = vpop.permute.xlu0 %842  ;;  %v1832_v50 = vld [vmem:[#allocation29_spill] sm:$0xff] }
 0x15f   :  { %v828_v14 = vpop.permute.xlu1 %827  ;;  %v916_v52 = vmul.f32 %v843_v17, %v692_v39  ;;  %v470_v9 = vadd.f32 %v1832_v50, %v278_v8  ;;  %v695_v12 = vmax.f32 %v663_v18, 0.0 }
 0x160   :  { %v913_v28 = vmul.f32 %v828_v14, %v689_v3  ;;  %v943_v25 = vadd.f32 %v942_v13, %v912_v63  ;;  %v635_v63 = vmul.f32 %v1594_v23, %v1836_v10  ;;  %v665_v13 = vadd.f32 %v633_v48, %v469_v11 }
 0x161   :  { %v666_v58 = vadd.f32 %v634_v62, %v470_v9 }
 0x162   :  { %v944_v24 = vadd.f32 %v943_v25, %v913_v28  ;;  %v853_v34 = vpop.permute.xlu0 %852  ;;  %v667_v51 = vadd.f32 %v635_v63, %v471_v32  ;;  %v697_v42 = vmax.f32 %v665_v13, 0.0 }
 0x163   :  { %v838_v37 = vpop.permute.xlu1 %837  ;;  %v918_v17 = vmul.f32 %v853_v34, %v694_v20  ;;  %v698_v15 = vmax.f32 %v666_v58, 0.0 }
 0x164   :  { %v915_v53 = vmul.f32 %v838_v37, %v691_v47  ;;  %v945_v59 = vadd.f32 %v944_v24, %v914_v5  ;;  %v699_v5 = vmax.f32 %v667_v51, 0.0  ;;  %v1839_v37 = vld [vmem:[#allocation30_spill] sm:$0xff] }
 0x165   :  { %v281_v36 = vmul.f32 %v1383_v41, %v1839_v37 }
 0x166   :  { %v946_v16 = vadd.f32 %v945_v59, %v915_v53  ;;  %v863_v29 = vpop.permute.xlu0 %862 }
 0x167   :  { %v848_v31 = vpop.permute.xlu1 %847  ;;  %v920_v33 = vmul.f32 %v863_v29, %v696_v45  ;;  %v473_v8 = vadd.f32 %v1841_v43, %v281_v36 }
 0x168   :  { %v917_v46 = vmul.f32 %v848_v31, %v693_v26  ;;  %v947_v30 = vadd.f32 %v946_v16, %v916_v52  ;;  %v282_v26 = vmul.f32 %v1383_v41, %v1842_v60  ;;  %v1843_v16 = vld [vmem:[#allocation32_spill] sm:$0xff] }
 0x16a   :  { %v948_v3 = vadd.f32 %v947_v30, %v917_v46  ;;  %v868_v21 = vpop.permute.xlu0 %867  ;;  %v474_v29 = vadd.f32 %v1843_v16, %v282_v26 }
 0x16b   :  { %v858_v14 = vpop.permute.xlu1 %857  ;;  %v921_v4 = vmul.f32 %v868_v21, %v697_v42 }
 0x16c   :  { %v919_v28 = vmul.f32 %v858_v14, %v695_v12  ;;  %v949_v25 = vadd.f32 %v948_v3, %v918_v17  ;;  %v965_v17 = vstv %s1758_s4 }
 0x16e   :  { %v950_v56 = vadd.f32 %v949_v25, %v919_v28  ;;  %v873_v27 = vpop.permute.xlu0 %872 }
 0x16f   :  { %v922_v24 = vmul.f32 %v873_v27, %v698_v15 }
 0x170   :  { %v951_v44 = vadd.f32 %v950_v56, %v920_v33  ;;  %v593_v22 = vpop.permute.xlu1 %592 }
 0x171   :  { %v636_v39 = vmul.f32 %v1594_v23, %v593_v22 }
 0x172   :  { %v952_v34 = vadd.f32 %v951_v44, %v921_v4  ;;  %v878_v47 = vpop.permute.xlu0 %877 }
 0x173   :  { %v923_v0 = vmul.f32 %v878_v47, %v699_v5  ;;  %v668_v18 = vadd.f32 %v636_v39, %v472_v61 }
 0x174   :  { %v953_v19 = vadd.f32 %v952_v34, %v922_v24  ;;  %v597_v53 = vpop.permute.xlu1 %596 }
 0x175   :  { %v637_v59 = vmul.f32 %v1594_v23, %v597_v53  ;;  %v700_v31 = vmax.f32 %v668_v18, 0.0 }
 0x176   :  { %v954_v35 = vadd.f32 %v953_v19, %v923_v0  ;;  %v888_v7 = vpop.permute.xlu0 %887 }
 0x177   :  { %v669_v38 = vadd.f32 %v637_v59, %v473_v8 }
 0x178   :  { %v601_v48 = vpop.permute.xlu1 %600 }
 0x179   :  { %v638_v52 = vmul.f32 %v1594_v23, %v601_v48  ;;  %v701_v55 = vmax.f32 %v669_v38, 0.0 }
 0x17b   :  { %v670_v20 = vadd.f32 %v638_v52, %v474_v29  ;;  %v925_v11 = vmul.f32 %v888_v7, %v701_v55 }
 0x17d   :  { %v883_v50 = vpop.permute.xlu1 %882  ;;  %v702_v30 = vmax.f32 %v670_v20, 0.0 }
 0x17e   :  { %v924_v9 = vmul.f32 %v883_v50, %v700_v31 }
 0x180   :  { %v955_v46 = vadd.f32 %v954_v35, %v924_v9 }
 0x181   :  { %v893_v57 = vpop.permute.xlu1 %892 }
 0x182   :  { %v926_v62 = vmul.f32 %v893_v57, %v702_v30  ;;  %v956_v54 = vadd.f32 %v955_v46, %v925_v11 }
 0x184   :  { %v957_v41 = vadd.f32 %v956_v54, %v926_v62 }
 0x186   :  { %v958_v1 = vrot.slane %v957_v41, 4 }
 0x188   :  { %v959_v10 = vadd.f32 %v958_v1, %v957_v41 }
 0x18a   :  { %v960_v63 = vrot.slane %v959_v10, 2 }
 0x18c   :  { %v961_v13 = vadd.f32 %v960_v63, %v959_v10 }
 0x18e   :  { %v962_v23 = vrot.slane %v961_v13, 1 }
 0x190   :  { %v963_v3 = vadd.f32 %v962_v23, %v961_v13 }
 0x192   :  { %v966_v21 = vadd.f32 %v965_v17, %v963_v3 }
 0x194   :  { %967 = vst [vmem:[#allocation3] sm:$0x1] %v966_v21 }
 0x195   :  { %1003 = shalt.err (!%p1000_p4)
}
 0x196   :  { %977 = dma.vmem_to_hbm [thread:$0]  %s975_s29, 16, %s1759_s5, [#allocation4]  }
 0x197   :  { %1012 = dma.done.wait [#allocation4], 16  }
 0x198   :  { %1013 = vsyncadd [#allocation4], 4294967280 }
 0x199   :  { %981 = vsyncpa [#allocation4], 1 }

</bundles_post_ra>
